<compile_context>
chip_gen: v5e
topology: v5e:2x2
jax: 0.10.0
libtpu: 0.0.40
codegen_flags: <defaults>
</compile_context>

<pallas_src>
import jax
import jax.numpy as jnp
from jax.experimental import pallas as pl
from jax.experimental.pallas import tpu as pltpu

_LANE = 128
_SUBLANE = 8
_MIN_ROWS_FOR_TC_SPLIT = 512  # only split a single-tile batch across 2 TCs above this


def _round_up(x, m):
    return ((x + m - 1) // m) * m


def _make_actor_kernel(num_actions):
    """Kernel closure; static `num_actions` masks the lane-padded logits."""

    def actor_kernel(x_ref, w1_ref, b1_ref, w2_ref, b2_ref, w3_ref, b3_ref, out_ref):
        x = x_ref[...]
        if x.dtype != jnp.bfloat16:  # accept bf16 states directly, no wrapper cast
            x = x.astype(jnp.bfloat16)

        # Linear(in, fc1) + ReLU : bf16 MXU matmul, f32 accumulate, bf16 intermediate.
        h1 = jnp.dot(x, w1_ref[...], preferred_element_type=jnp.float32) + b1_ref[...]
        h1 = jnp.maximum(h1, 0.0).astype(jnp.bfloat16)

        # Linear(fc1, fc2) + ReLU
        h2 = jnp.dot(h1, w2_ref[...], preferred_element_type=jnp.float32) + b2_ref[...]
        h2 = jnp.maximum(h2, 0.0).astype(jnp.bfloat16)

        # Linear(fc2, out) on the lane-padded (multiple-of-128) projection.
        logits = jnp.dot(h2, w3_ref[...], preferred_element_type=jnp.float32) + b3_ref[...]

        # Explicitly mask padded action lanes (robust regardless of bias dtype).
        lane = jax.lax.broadcasted_iota(jnp.int32, logits.shape, dimension=1)
        logits = jnp.where(lane < num_actions, logits, jnp.float32(-1e30))

        # Numerically stable softmax over the 128-lane slab; padded lanes -> exactly 0.
        m = jnp.max(logits, axis=-1, keepdims=True)
        e = jnp.exp(logits - m)
        denom = jnp.sum(e, axis=-1, keepdims=True)
        # Exact f32 normalization (PPO takes log(probs) downstream; the approx
        # EUP reciprocal alone left row sums off by >1e-3).
        probs = e / denom
        out_ref[...] = probs.astype(out_ref.dtype)

        # TODO(synk): optionally fuse Gumbel-max action sampling here
        # (pltpu.prng_seed / prng_random_bits) and emit (action, log_prob) to
        # shrink the HBM writeback ~60x in the rollout loop; kept as a probs
        # table to preserve the module's forward() -> Categorical(probs) contract.

    return actor_kernel


def _choose_batch_tiling(batch, block_b):
    """Adaptive batch tile: <= ~7 padded rows per tile, and >= 2 grid steps for
    large batches so the 'parallel' axis shards across both v7x TensorCores."""
    n_tiles = pl.cdiv(batch, block_b)
    if n_tiles == 1 and batch >= _MIN_ROWS_FOR_TC_SPLIT:
        n_tiles = 2
    tb = _round_up(pl.cdiv(batch, n_tiles), _SUBLANE)
    n_tiles = pl.cdiv(batch, tb)  # re-derive after sublane rounding
    return tb, n_tiles * tb


def actor_forward(state, params, num_actions, *, block_b=4096,
                  out_dtype=jnp.bfloat16, trim=True):
    """Categorical probabilities for each state row.

    trim=True  -> [B, num_actions]
    trim=False -> lane-dense padded slab [B_pad, 128*k] (padded action lanes are
                  exactly 0; padded batch rows >= B are garbage and must be
                  ignored by the consumer).  Skips the wrapper-side slice copy.
    """
    w1, b1, w2, b2, w3, b3 = params
    B, d_in = state.shape
    fc1, fc2, n_pad = w1.shape[1], w2.shape[1], w3.shape[1]

    tb, b_pad = _choose_batch_tiling(B, block_b)
    if b_pad != B:
        state = jnp.pad(state, ((0, b_pad - B), (0, 0)))

    flops = 2 * b_pad * (d_in * fc1 + fc1 * fc2 + fc2 * n_pad)
    bytes_accessed = (
        b_pad * d_in * state.dtype.itemsize
        + sum(int(a.size) * a.dtype.itemsize for a in params)
        + b_pad * n_pad * jnp.dtype(out_dtype).itemsize
    )

    # Weights/biases: constant index_map -> DMA'd once, resident in VMEM across tiles.
    resident = lambda a: pl.BlockSpec(a.shape, lambda i: (0, 0))

    probs_padded = pl.pallas_call(
        _make_actor_kernel(num_actions),
        out_shape=jax.ShapeDtypeStruct((b_pad, n_pad), out_dtype),
        grid=(b_pad // tb,),
        in_specs=[
            pl.BlockSpec((tb, d_in), lambda i: (i, 0)),
            resident(w1), resident(b1),
            resident(w2), resident(b2),
            resident(w3), resident(b3),
        ],
        out_specs=pl.BlockSpec((tb, n_pad), lambda i: (i, 0)),
        compiler_params=pltpu.CompilerParams(
            dimension_semantics=("parallel",)),
        cost_estimate=pl.CostEstimate(
            flops=flops,
            transcendentals=b_pad * n_pad,
            bytes_accessed=bytes_accessed),
    )(state, w1, b1, w2, b2, w3, b3)

    if not trim:
        return probs_padded
    return probs_padded[:B, :num_actions]


def init_params(key, input_dim, fc1_dims, fc2_dims, output_dim):
    """Mimics nn.Linear's U(-1/sqrt(fan_in), 1/sqrt(fan_in)) init.

    Weights stored bf16 (native MXU dtype, half the weight HBM traffic) as
    [in, out]; biases f32 [1, out].  The final projection is lane-padded to a
    multiple of 128 columns with zero weights/bias — the kernel masks padded
    lanes, so no special bias value is required.  Note: bf16 weights differ
    from a pure-f32 torch reference at ~1e-3 relative (intentional)."""
    ks = jax.random.split(key, 6)
    n_pad = max(_LANE, _round_up(output_dim, _LANE))

    def linear(kw, kb, fan_in, fan_out):
        bound = 1.0 / jnp.sqrt(fan_in)
        w = jax.random.uniform(kw, (fan_in, fan_out), jnp.float32, -bound, bound)
        b = jax.random.uniform(kb, (1, fan_out), jnp.float32, -bound, bound)
        return w, b

    w1, b1 = linear(ks[0], ks[1], input_dim, fc1_dims)
    w2, b2 = linear(ks[2], ks[3], fc1_dims, fc2_dims)
    w3, b3 = linear(ks[4], ks[5], fc2_dims, output_dim)

    w3p = jnp.zeros((fc2_dims, n_pad), jnp.float32).at[:, :output_dim].set(w3)
    b3p = jnp.zeros((1, n_pad), jnp.float32).at[:, :output_dim].set(b3)

    return (w1.astype(jnp.bfloat16), b1,
            w2.astype(jnp.bfloat16), b2,
            w3p.astype(jnp.bfloat16), b3p)


def actor_forward_ref(state, params, num_actions):
    """Pure-JAX reference with the same bf16-matmul / f32-accumulate policy."""
    w1, b1, w2, b2, w3, b3 = params
    f32 = jnp.float32
    h1 = jnp.maximum(
        jnp.dot(state.astype(jnp.bfloat16), w1, preferred_element_type=f32) + b1,
        0.0).astype(jnp.bfloat16)
    h2 = jnp.maximum(
        jnp.dot(h1, w2, preferred_element_type=f32) + b2, 0.0).astype(jnp.bfloat16)
    logits = jnp.dot(h2, w3, preferred_element_type=f32) + b3
    return jax.nn.softmax(logits[:, :num_actions], axis=-1)


if __name__ == "__main__":
    # Small shapes consistent with the module: state [B, input_dim].
    B = 8
    INPUT_DIM = 32      # input_dims = (32,)
    FC1 = 256
    FC2 = 256
    OUTPUT_DIM = 8      # number of discrete actions

    key = jax.random.PRNGKey(0)
    k_params, k_state = jax.random.split(key)

    params = init_params(k_params, INPUT_DIM, FC1, FC2, OUTPUT_DIM)
    state = jax.random.normal(k_state, (B, INPUT_DIM), jnp.float32)

    # Perf-default path (bf16 probability slab) and f32 path (tight check).
    probs_bf16 = jax.block_until_ready(actor_forward(state, params, OUTPUT_DIM))
    probs_f32 = jax.block_until_ready(
        actor_forward(state, params, OUTPUT_DIM, out_dtype=jnp.float32))

    ref = actor_forward_ref(state, params, OUTPUT_DIM)

    assert probs_bf16.shape == (B, OUTPUT_DIM) and probs_bf16.dtype == jnp.bfloat16
    assert probs_f32.shape == (B, OUTPUT_DIM) and probs_f32.dtype == jnp.float32

    # f32 output: exact normalization; only bf16-matmul noise vs the reference.
    assert jnp.allclose(jnp.sum(probs_f32, axis=-1), 1.0, atol=1e-3)
    assert jnp.allclose(probs_f32, ref, atol=2e-3, rtol=2e-3)

    # bf16 output: adds ~2^-9 relative output rounding on top of the above.
    pb = probs_bf16.astype(jnp.float32)
    assert jnp.allclose(jnp.sum(pb, axis=-1), 1.0, atol=1e-2)
    assert jnp.allclose(pb, ref, atol=6e-3, rtol=6e-3)

    # TODO(synk): torch.distributions.Categorical sampling / log_prob, the Adam
    # optimizer and checkpoint I/O are host-side bookkeeping, not kernel compute;
    # the kernel returns the Categorical's probability table.
    print("KERNEL_OK")
</pallas_src>

<mosaic_0001>
module attributes {stable_mosaic.version = 11 : i64} {
  func.func @actor_kernel(%arg0: i32, %arg1: memref<8x32xf32, #tpu.memory_space<vmem>>, %arg2: memref<32x256xbf16, #tpu.memory_space<vmem>>, %arg3: memref<1x256xf32, #tpu.memory_space<vmem>>, %arg4: memref<256x256xbf16, #tpu.memory_space<vmem>>, %arg5: memref<1x256xf32, #tpu.memory_space<vmem>>, %arg6: memref<256x128xbf16, #tpu.memory_space<vmem>>, %arg7: memref<1x128xf32, #tpu.memory_space<vmem>>, %arg8: memref<8x128xbf16, #tpu.memory_space<vmem>>) attributes {dimension_semantics = [#tpu.dimension_semantics<parallel>], iteration_bounds = array<i64: 1>, scalar_prefetch = 0 : i64, scratch_operands = 0 : i64, tpu.core_type = #tpu.core_type<tc>, window_params = [{transform_indices = @transform_0, window_bounds = array<i64: 8, 32>}, {pipeline_mode = #tpu.pipeline_mode<synchronous>, transform_indices = @transform_1, window_bounds = array<i64: 32, 256>}, {pipeline_mode = #tpu.pipeline_mode<synchronous>, transform_indices = @transform_2, window_bounds = array<i64: 1, 256>}, {pipeline_mode = #tpu.pipeline_mode<synchronous>, transform_indices = @transform_3, window_bounds = array<i64: 256, 256>}, {pipeline_mode = #tpu.pipeline_mode<synchronous>, transform_indices = @transform_4, window_bounds = array<i64: 1, 256>}, {pipeline_mode = #tpu.pipeline_mode<synchronous>, transform_indices = @transform_5, window_bounds = array<i64: 256, 128>}, {pipeline_mode = #tpu.pipeline_mode<synchronous>, transform_indices = @transform_6, window_bounds = array<i64: 1, 128>}, {transform_indices = @transform_7, window_bounds = array<i64: 8, 128>}]} {
    %c0 = arith.constant 0 : index
    %c0_0 = arith.constant 0 : index
    %0 = vector.load %arg1[%c0, %c0_0] : memref<8x32xf32, #tpu.memory_space<vmem>>, vector<8x32xf32>
    %1 = arith.truncf %0 : vector<8x32xf32> to vector<8x32xbf16>
    %c0_1 = arith.constant 0 : index
    %c0_2 = arith.constant 0 : index
    %2 = vector.load %arg2[%c0_1, %c0_2] : memref<32x256xbf16, #tpu.memory_space<vmem>>, vector<32x256xbf16>
    %cst = arith.constant dense<0.000000e+00> : vector<8x256xf32>
    %3 = tpu.matmul %1, %2, %cst {dimension_numbers = #tpu.dot_dimension_numbers<[1], [0], [0], [1], [0, 0, 1, 1], [], []>} : vector<8x32xbf16>, vector<32x256xbf16>, vector<8x256xf32> -> vector<8x256xf32>
    %c0_3 = arith.constant 0 : index
    %c0_4 = arith.constant 0 : index
    %4 = vector.load %arg3[%c0_3, %c0_4] : memref<1x256xf32, #tpu.memory_space<vmem>>, vector<1x256xf32>
    %5 = vector.broadcast %4 : vector<1x256xf32> to vector<8x256xf32>
    %6 = arith.addf %3, %5 : vector<8x256xf32>
    %cst_5 = arith.constant 0.000000e+00 : f32
    %7 = vector.broadcast %cst_5 : f32 to vector<8x256xf32>
    %8 = arith.maximumf %6, %7 : vector<8x256xf32>
    %9 = arith.truncf %8 : vector<8x256xf32> to vector<8x256xbf16>
    %c0_6 = arith.constant 0 : index
    %c0_7 = arith.constant 0 : index
    %10 = vector.load %arg4[%c0_6, %c0_7] : memref<256x256xbf16, #tpu.memory_space<vmem>>, vector<256x256xbf16>
    %cst_8 = arith.constant dense<0.000000e+00> : vector<8x256xf32>
    %11 = tpu.matmul %9, %10, %cst_8 {dimension_numbers = #tpu.dot_dimension_numbers<[1], [0], [0], [1], [0, 0, 1, 1], [], []>} : vector<8x256xbf16>, vector<256x256xbf16>, vector<8x256xf32> -> vector<8x256xf32>
    %c0_9 = arith.constant 0 : index
    %c0_10 = arith.constant 0 : index
    %12 = vector.load %arg5[%c0_9, %c0_10] : memref<1x256xf32, #tpu.memory_space<vmem>>, vector<1x256xf32>
    %13 = vector.broadcast %12 : vector<1x256xf32> to vector<8x256xf32>
    %14 = arith.addf %11, %13 : vector<8x256xf32>
    %cst_11 = arith.constant 0.000000e+00 : f32
    %15 = vector.broadcast %cst_11 : f32 to vector<8x256xf32>
    %16 = arith.maximumf %14, %15 : vector<8x256xf32>
    %17 = arith.truncf %16 : vector<8x256xf32> to vector<8x256xbf16>
    %c0_12 = arith.constant 0 : index
    %c0_13 = arith.constant 0 : index
    %18 = vector.load %arg6[%c0_12, %c0_13] : memref<256x128xbf16, #tpu.memory_space<vmem>>, vector<256x128xbf16>
    %cst_14 = arith.constant dense<0.000000e+00> : vector<8x128xf32>
    %19 = tpu.matmul %17, %18, %cst_14 {dimension_numbers = #tpu.dot_dimension_numbers<[1], [0], [0], [1], [0, 0, 1, 1], [], []>} : vector<8x256xbf16>, vector<256x128xbf16>, vector<8x128xf32> -> vector<8x128xf32>
    %c0_15 = arith.constant 0 : index
    %c0_16 = arith.constant 0 : index
    %20 = vector.load %arg7[%c0_15, %c0_16] : memref<1x128xf32, #tpu.memory_space<vmem>>, vector<1x128xf32>
    %21 = vector.broadcast %20 : vector<1x128xf32> to vector<8x128xf32>
    %22 = arith.addf %19, %21 : vector<8x128xf32>
    %23 = tpu.iota {dimensions = array<i32: 1>} : vector<8x128xi32>
    %c8_i32 = arith.constant 8 : i32
    %24 = vector.broadcast %c8_i32 : i32 to vector<8x128xi32>
    %25 = arith.cmpi slt, %23, %24 : vector<8x128xi32>
    %cst_17 = arith.constant -1.000000e+30 : f32
    %26 = vector.broadcast %cst_17 : f32 to vector<8x128xf32>
    %27 = arith.select %25, %22, %26 : vector<8x128xi1>, vector<8x128xf32>
    %cst_18 = arith.constant dense<0xFF800000> : vector<8xf32>
    %28 = vector.multi_reduction <maximumf>, %27, %cst_18 [1] : vector<8x128xf32> to vector<8xf32>
    %29 = vector.shape_cast %28 : vector<8xf32> to vector<8x1xf32>
    %30 = vector.broadcast %29 : vector<8x1xf32> to vector<8x128xf32>
    %31 = arith.subf %27, %30 : vector<8x128xf32>
    %32 = math.exp %31 : vector<8x128xf32>
    %cst_19 = arith.constant dense<0.000000e+00> : vector<8xf32>
    %33 = vector.multi_reduction <add>, %32, %cst_19 [1] : vector<8x128xf32> to vector<8xf32>
    %34 = vector.shape_cast %33 : vector<8xf32> to vector<8x1xf32>
    %35 = vector.broadcast %34 : vector<8x1xf32> to vector<8x128xf32>
    %36 = arith.divf %32, %35 : vector<8x128xf32>
    %37 = arith.truncf %36 : vector<8x128xf32> to vector<8x128xbf16>
    %c0_20 = arith.constant 0 : index
    %c0_21 = arith.constant 0 : index
    %38 = vector.load %arg8[%c0_20, %c0_21] : memref<8x128xbf16, #tpu.memory_space<vmem>>, vector<8x128xbf16>
    tpu.vector_store %arg8[%c0_20, %c0_21], %37 {strides = array<i32>} : memref<8x128xbf16, #tpu.memory_space<vmem>>, vector<8x128xbf16>,
    return
  }
  func.func @transform_0(%arg0: i32) -> (i32, i32) {
    %c0_i32 = arith.constant 0 : i32
    %c0_i32_0 = arith.constant 0 : i32
    return %arg0, %c0_i32 : i32, i32
  }
  func.func @transform_1(%arg0: i32) -> (i32, i32) {
    %c0_i32 = arith.constant 0 : i32
    %c0_i32_0 = arith.constant 0 : i32
    %c0_i32_1 = arith.constant 0 : i32
    return %c0_i32, %c0_i32_0 : i32, i32
  }
  func.func @transform_2(%arg0: i32) -> (i32, i32) {
    %c0_i32 = arith.constant 0 : i32
    %c0_i32_0 = arith.constant 0 : i32
    %c0_i32_1 = arith.constant 0 : i32
    return %c0_i32, %c0_i32_0 : i32, i32
  }
  func.func @transform_3(%arg0: i32) -> (i32, i32) {
    %c0_i32 = arith.constant 0 : i32
    %c0_i32_0 = arith.constant 0 : i32
    %c0_i32_1 = arith.constant 0 : i32
    return %c0_i32, %c0_i32_0 : i32, i32
  }
  func.func @transform_4(%arg0: i32) -> (i32, i32) {
    %c0_i32 = arith.constant 0 : i32
    %c0_i32_0 = arith.constant 0 : i32
    %c0_i32_1 = arith.constant 0 : i32
    return %c0_i32, %c0_i32_0 : i32, i32
  }
  func.func @transform_5(%arg0: i32) -> (i32, i32) {
    %c0_i32 = arith.constant 0 : i32
    %c0_i32_0 = arith.constant 0 : i32
    %c0_i32_1 = arith.constant 0 : i32
    return %c0_i32, %c0_i32_0 : i32, i32
  }
  func.func @transform_6(%arg0: i32) -> (i32, i32) {
    %c0_i32 = arith.constant 0 : i32
    %c0_i32_0 = arith.constant 0 : i32
    %c0_i32_1 = arith.constant 0 : i32
    return %c0_i32, %c0_i32_0 : i32, i32
  }
  func.func @transform_7(%arg0: i32) -> (i32, i32) {
    %c0_i32 = arith.constant 0 : i32
    %c0_i32_0 = arith.constant 0 : i32
    return %arg0, %c0_i32 : i32, i32
  }
}

</mosaic_0001>

<bundles_post_ra>
// kernel: tpu_custom_call.1
= control target key start
LH: loop header
LB: loop body
LE: loop exit
PB: predicated region body
PF: predicated region fallthrough
CT: control target
= control target key end

     0   :  { %12 = vsyncpa [#allocation3], 0  ;;  %s1132_s0 = inlined_call_operand.hbm [shape: f32[8,32], index: 0, kind: input, shape index: {}]   ;;  %s1133_s1 = inlined_call_operand.hbm [shape: bf16[32,256], index: 1, kind: input, shape index: {}]   ;;  %s1134_s2 = inlined_call_operand.hbm [shape: f32[1,256], index: 2, kind: input, shape index: {}]   ;;  %s1135_s3 = inlined_call_operand.hbm [shape: bf16[256,256], index: 3, kind: input, shape index: {}]   ;;  %s1136_s4 = inlined_call_operand.vmem [shape: f32[1,256], index: 4, kind: input, shape index: {}]   ;;  %s1137_s5 = inlined_call_operand.hbm [shape: bf16[256,128], index: 5, kind: input, shape index: {}]   ;;  %s1138_s6 = inlined_call_operand.vmem [shape: f32[1,128], index: 6, kind: input, shape index: {}]   ;;  %s1139_s7 = inlined_call_operand.hbm [shape: bf16[8,128], index: 7, kind: output, shape index: {}]  }
   0x1   :  { %13 = vsyncpa [#allocation6], 0 }
   0x2   :  { %14 = vsyncpa [#allocation9], 0  ;;  %s31_s26 = sshll.u32 %s1133_s1, 4  ;;  %s32_s26 = int_to_ptr.hbm [resolvable:$true] %s31_s26 }
   0x3   :  { %15 = vsyncpa [#allocation4], 0  ;;  %s1056_s27 = smov [#allocation5]   ;;  %s55_s8 = sshll.u32 %s1135_s3, 4  ;;  %s56_s8 = int_to_ptr.hbm [resolvable:$true] %s55_s8 }
   0x4   :  { %s33_s28 = sshll.u32 %s1056_s27, 4  ;;  %s1057_s9 = smov 128   ;;  %s34_s28 = int_to_ptr.vmem [resolvable:$true] %s33_s28 }
   0x5   :  { %s1058_s10 = smov 8   ;;  %s1059_s11 = smov [#allocation8]  }
   0x6   :  { %39 = dma.hbm_to_vmem [thread:$0]  %s32_s26, 512, %s34_s28, [#allocation6], %s1057_s9, %s1057_s9, %s1058_s10  }
   0x7   :  { %s57_s12 = sshll.u32 %s1059_s11, 4  ;;  %s21_s15 = sshll.u32 %s1132_s0, 4  ;;  %s58_s12 = int_to_ptr.vmem [resolvable:$true] %s57_s12  ;;  %s22_s15 = int_to_ptr.hbm [resolvable:$true] %s21_s15 }
   0x8   :  { %63 = dma.hbm_to_vmem [thread:$0]  %s56_s8, 4096, %s58_s12, [#allocation9], %s1057_s9, %s1057_s9, %s1058_s10  }
   0x9   :  { %s45_s17 = sshll.u32 %s1134_s2, 4  ;;  %s1060_s18 = smov [#allocation2]   ;;  %s46_s17 = int_to_ptr.hbm [resolvable:$true] %s45_s17 }
   0xa   :  { %s23_s19 = sshll.u32 %s1060_s18, 4  ;;  %s1061_s3 = smov [#allocation7]   ;;  %s24_s19 = int_to_ptr.vmem [resolvable:$true] %s23_s19 }
   0xb   :  { %26 = dma.hbm_to_vmem [thread:$0]  %s22_s15, 128, %s24_s19, [#allocation3]  }
   0xc   :  { %s47_s20 = sshll.u32 %s1061_s3, 4  ;;  %s70_s23 = sshll.u32 %s1137_s5, 4  ;;  %s48_s20 = int_to_ptr.vmem [resolvable:$true] %s47_s20  ;;  %s71_s23 = int_to_ptr.hbm [resolvable:$true] %s70_s23 }
   0xd   :  { %50 = dma.hbm_to_vmem [thread:$0]  %s46_s17, 32, %s48_s20, [#allocation6]  }
   0xe   :  { %s1062_s0 = smov [#allocation10]   ;;  %s1063_s25 = smov 64  }
   0xf   :  { %s72_s24 = sshll.u32 %s1062_s0, 4  ;;  %s1064_s26 = smov 4   ;;  %s73_s24 = int_to_ptr.vmem [resolvable:$true] %s72_s24 }
  0x10   :  { %78 = dma.hbm_to_vmem [thread:$0]  %s71_s23, 2048, %s73_s24, [#allocation9], %s1063_s25, %s1063_s25, %s1064_s26  }
  0x11   :  { %1048 = dma.done.wait [#allocation3], 128  }
  0x12   :  { %1049 = vsyncadd [#allocation3], 4294967168 }
  0x13   :  { %1050 = dma.done.wait [#allocation6], 544  }
  0x14   :  { %1051 = vsyncadd [#allocation6], 4294966752 }
  0x15   :  { %1052 = dma.done.wait [#allocation9], 6144  }
  0x16   :  { %1053 = vsyncadd [#allocation9], 4294961152  ;;  %v637_v0 = vld [vmem:[#allocation5 + $0x10] sm:$0xf]  ;;  %v840_v1 = vld [vmem:[#allocation5 + $0x14] sm:$0xf0] }
  0x17   :  { %v839_v2 = vld [vmem:[#allocation5 + $0x14] sm:$0xf]  ;;  %v638_v3 = vor.u32 %v840_v1, %v637_v0  ;;  %v639_v4 = vld [vmem:[#allocation5 + $0x18] sm:$0xf0]  ;;  %v629_v5 = vld [vmem:[#allocation5] sm:$0xf] }
  0x18   :  { %v838_v6 = vld [vmem:[#allocation5 + $0x4] sm:$0xf0]  ;;  %v642_v7 = vor.u32 %v839_v2, %v639_v4  ;;  %v837_v8 = vld [vmem:[#allocation5 + $0x4] sm:$0xf]  ;;  %v631_v9 = vld [vmem:[#allocation5 + $0x8] sm:$0xf0] }
  0x19   :  { %v102_v10 = vld [vmem:[#allocation2] sm:$0xff]  ;;  %vm134_vm0 = vcmask 261120   ;;  %144 = vmatpush.bf16.msra.mxu0 %v638_v3  ;;  %v630_v11 = vor.u32 %v838_v6, %v629_v5  ;;  %v703_v12 = vld [vmem:[#allocation8 + $0x70] sm:$0xf]  ;;  %v634_v15 = vor.u32 %v837_v8, %v631_v9  ;;  %v695_v24 = vld [vmem:[#allocation8 + $0x60] sm:$0xf] }
  0x1a   :  { %v856_v13 = vld [vmem:[#allocation8 + $0x74] sm:$0xf0]  ;;  %v767_v14 = vld [vmem:[#allocation8 + $0xf0] sm:$0xf]  ;;  %157 = vmatpush.bf16.msra.mxu1 %v642_v7  ;;  %v855_v18 = vld [vmem:[#allocation8 + $0x74] sm:$0xf]  ;;  %v103_v25 = vpack.c.bf16 %v102_v10, %v102_v10 }
  0x1b   :  { %v704_v16 = vor.u32 %v856_v13, %v703_v12  ;;  %v872_v17 = vld [vmem:[#allocation8 + $0xf4] sm:$0xf0]  ;;  %v705_v19 = vld [vmem:[#allocation8 + $0x78] sm:$0xf0]  ;;  %v871_v22 = vld [vmem:[#allocation8 + $0xf4] sm:$0xf] }
  0x1c   :  { %v768_v20 = vor.u32 %v872_v17, %v767_v14  ;;  %v708_v21 = vor.u32 %v855_v18, %v705_v19  ;;  %v769_v23 = vld [vmem:[#allocation8 + $0xf8] sm:$0xf0]  ;;  %v854_v27 = vld [vmem:[#allocation8 + $0x64] sm:$0xf0]  ;;  %v759_v28 = vld [vmem:[#allocation8 + $0xe0] sm:$0xf] }
  0x1d   :  { %366 = vmatpush.bf16.msra.mxu2 %v704_v16  ;;  %v772_v26 = vor.u32 %v871_v22, %v769_v23  ;;  %v870_v29 = vld [vmem:[#allocation8 + $0xe4] sm:$0xf0]  ;;  %145 = vmatpush.bf16.msra.mxu0 %v630_v11  ;;  %v696_v30 = vor.u32 %v854_v27, %v695_v24  ;;  %v853_v32 = vld [vmem:[#allocation8 + $0x64] sm:$0xf]  ;;  %v697_v33 = vld [vmem:[#allocation8 + $0x68] sm:$0xf0] }
  0x1e   :  { %379 = vmatpush.bf16.msra.mxu3 %v768_v20  ;;  %v760_v31 = vor.u32 %v870_v29, %v759_v28  ;;  %v869_v34 = vld [vmem:[#allocation8 + $0xe4] sm:$0xf]  ;;  %158 = vmatpush.bf16.msra.mxu1 %v634_v15  ;;  %v700_v35 = vor.u32 %v853_v32, %v697_v33  ;;  %v761_v36 = vld [vmem:[#allocation8 + $0xe8] sm:$0xf0]  ;;  %v687_v37 = vld [vmem:[#allocation8 + $0x50] sm:$0xf] }
  0x1f   :  { %v852_v38 = vld [vmem:[#allocation8 + $0x54] sm:$0xf0]  ;;  %v764_v39 = vor.u32 %v869_v34, %v761_v36  ;;  %v751_v40 = vld [vmem:[#allocation8 + $0xd0] sm:$0xf]  ;;  %v851_v42 = vld [vmem:[#allocation8 + $0x54] sm:$0xf] }
  0x20   :  { %v868_v41 = vld [vmem:[#allocation8 + $0xd4] sm:$0xf0]  ;;  %643 = vmatmul.msk.bf16.vlgmr.msra.gmra.mxu0 %vm134_vm0, %v103_v25  ;;  %v688_v43 = vor.u32 %v852_v38, %v687_v37  ;;  %v689_v44 = vld [vmem:[#allocation8 + $0x58] sm:$0xf0]  ;;  %v867_v45 = vld [vmem:[#allocation8 + $0xd4] sm:$0xf] }
  0x21   :  { %392 = vmatpush.bf16.msrb.mxu0 %v708_v21  ;;  %367 = vmatpush.bf16.msra.mxu2 %v696_v30  ;;  %v753_v46 = vld [vmem:[#allocation8 + $0xd8] sm:$0xf0]  ;;  %v752_v47 = vor.u32 %v868_v41, %v751_v40  ;;  %v679_v48 = vld [vmem:[#allocation8 + $0x40] sm:$0xf]  ;;  %v850_v49 = vld [vmem:[#allocation8 + $0x44] sm:$0xf0]  ;;  %v692_v50 = vor.u32 %v851_v42, %v689_v44 }
  0x22   :  { %405 = vmatpush.bf16.msrb.mxu1 %v772_v26  ;;  %380 = vmatpush.bf16.msra.mxu3 %v760_v31  ;;  %v743_v51 = vld [vmem:[#allocation8 + $0xc0] sm:$0xf]  ;;  %v866_v52 = vld [vmem:[#allocation8 + $0xc4] sm:$0xf0]  ;;  %v756_v53 = vor.u32 %v867_v45, %v753_v46  ;;  %v849_v54 = vld [vmem:[#allocation8 + $0x44] sm:$0xf]  ;;  %v680_v56 = vor.u32 %v850_v49, %v679_v48 }
  0x23   :  { %644 = vmatmul.msk.bf16.vlgmr.msra.gmra.mxu1 %vm134_vm0, %v103_v25  ;;  %v681_v55 = vld [vmem:[#allocation8 + $0x48] sm:$0xf0]  ;;  %v865_v57 = vld [vmem:[#allocation8 + $0xc4] sm:$0xf]  ;;  %v744_v59 = vor.u32 %v866_v52, %v743_v51  ;;  %v671_v60 = vld [vmem:[#allocation8 + $0x30] sm:$0xf] }
  0x24   :  { %v745_v58 = vld [vmem:[#allocation8 + $0xc8] sm:$0xf0]  ;;  %v848_v61 = vld [vmem:[#allocation8 + $0x34] sm:$0xf0]  ;;  %v684_v62 = vor.u32 %v849_v54, %v681_v55  ;;  %v735_v63 = vld [vmem:[#allocation8 + $0xb0] sm:$0xf] }
  0x25   :  { %393 = vmatpush.bf16.msrb.mxu0 %v700_v35  ;;  %368 = vmatpush.bf16.msra.mxu2 %v688_v43  ;;  %v864_v0 = vld [vmem:[#allocation8 + $0xb4] sm:$0xf0]  ;;  %v748_v1 = vor.u32 %v865_v57, %v745_v58  ;;  %v847_v2 = vld [vmem:[#allocation8 + $0x34] sm:$0xf]  ;;  %v673_v3 = vld [vmem:[#allocation8 + $0x38] sm:$0xf0]  ;;  %v672_v4 = vor.u32 %v848_v61, %v671_v60 }
  0x26   :  { %406 = vmatpush.bf16.msrb.mxu1 %v764_v39  ;;  %381 = vmatpush.bf16.msra.mxu3 %v752_v47  ;;  %v863_v5 = vld [vmem:[#allocation8 + $0xb4] sm:$0xf]  ;;  %v737_v6 = vld [vmem:[#allocation8 + $0xb8] sm:$0xf0]  ;;  %v736_v7 = vor.u32 %v864_v0, %v735_v63  ;;  %v663_v8 = vld [vmem:[#allocation8 + $0x20] sm:$0xf]  ;;  %v676_v10 = vor.u32 %v847_v2, %v673_v3 }
  0x27   :  { %v846_v9 = vld [vmem:[#allocation8 + $0x24] sm:$0xf0]  ;;  %v727_v11 = vld [vmem:[#allocation8 + $0xa0] sm:$0xf]  ;;  %v740_v13 = vor.u32 %v863_v5, %v737_v6  ;;  %v845_v14 = vld [vmem:[#allocation8 + $0x24] sm:$0xf] }
  0x28   :  { %v862_v12 = vld [vmem:[#allocation8 + $0xa4] sm:$0xf0]  ;;  %v665_v15 = vld [vmem:[#allocation8 + $0x28] sm:$0xf0]  ;;  %v664_v16 = vor.u32 %v846_v9, %v663_v8  ;;  %v861_v17 = vld [vmem:[#allocation8 + $0xa4] sm:$0xf] }
  0x29   :  { %394 = vmatpush.bf16.msrb.mxu0 %v692_v50  ;;  %369 = vmatpush.bf16.msra.mxu2 %v680_v56  ;;  %v729_v18 = vld [vmem:[#allocation8 + $0xa8] sm:$0xf0]  ;;  %v728_v19 = vor.u32 %v862_v12, %v727_v11  ;;  %v668_v20 = vor.u32 %v845_v14, %v665_v15  ;;  %v655_v22 = vld [vmem:[#allocation8 + $0x10] sm:$0xf]  ;;  %v844_v23 = vld [vmem:[#allocation8 + $0x14] sm:$0xf0] }
  0x2a   :  { %407 = vmatpush.bf16.msrb.mxu1 %v756_v53  ;;  %382 = vmatpush.bf16.msra.mxu3 %v744_v59  ;;  %v732_v21 = vor.u32 %v861_v17, %v729_v18  ;;  %v719_v24 = vld [vmem:[#allocation8 + $0x90] sm:$0xf]  ;;  %v656_v25 = vor.u32 %v844_v23, %v655_v22  ;;  %v860_v26 = vld [vmem:[#allocation8 + $0x94] sm:$0xf0]  ;;  %v843_v27 = vld [vmem:[#allocation8 + $0x14] sm:$0xf] }
  0x2b   :  { %v657_v28 = vld [vmem:[#allocation8 + $0x18] sm:$0xf0]  ;;  %v720_v29 = vor.u32 %v860_v26, %v719_v24  ;;  %v859_v31 = vld [vmem:[#allocation8 + $0x94] sm:$0xf]  ;;  %v647_v34 = vld [vmem:[#allocation8] sm:$0xf] }
  0x2c   :  { %v660_v30 = vor.u32 %v843_v27, %v657_v28  ;;  %v721_v32 = vld [vmem:[#allocation8 + $0x98] sm:$0xf0]  ;;  %v842_v35 = vld [vmem:[#allocation8 + $0x4] sm:$0xf0]  ;;  %v711_v36 = vld [vmem:[#allocation8 + $0x80] sm:$0xf] }
  0x2d   :  { %395 = vmatpush.bf16.msrb.mxu0 %v684_v62  ;;  %370 = vmatpush.bf16.msra.mxu2 %v672_v4  ;;  %v724_v33 = vor.u32 %v859_v31, %v721_v32  ;;  %v648_v37 = vor.u32 %v842_v35, %v647_v34  ;;  %v858_v38 = vld [vmem:[#allocation8 + $0x84] sm:$0xf0]  ;;  %v841_v39 = vld [vmem:[#allocation8 + $0x4] sm:$0xf]  ;;  %v649_v40 = vld [vmem:[#allocation8 + $0x8] sm:$0xf0]  ;;  %v580_v31 = vlaneseq }
  0x2e   :  { %408 = vmatpush.bf16.msrb.mxu1 %v748_v1  ;;  %383 = vmatpush.bf16.msra.mxu3 %v736_v7  ;;  %v712_v41 = vor.u32 %v858_v38, %v711_v36  ;;  %v652_v42 = vor.u32 %v841_v39, %v649_v40  ;;  %v857_v43 = vld [vmem:[#allocation8 + $0x84] sm:$0xf]  ;;  %v713_v44 = vld [vmem:[#allocation8 + $0x88] sm:$0xf0]  ;;  %v888_v46 = vld [vmem:[#allocation10 + $0x78] sm:$0xff]  ;;  %s615_s8 = sshll.u32 %s1139_s7, 4  ;;  %s616_s8 = int_to_ptr.hbm [resolvable:$true] %s615_s8 }
  0x2f   :  { %v716_v45 = vor.u32 %v857_v43, %v713_v44  ;;  %v880_v47 = vld [vmem:[#allocation10 + $0x38] sm:$0xff]  ;;  %v887_v48 = vld [vmem:[#allocation10 + $0x70] sm:$0xff]  ;;  %v886_v50 = vld [vmem:[#allocation10 + $0x68] sm:$0xff] }
  0x30   :  { %v879_v49 = vld [vmem:[#allocation10 + $0x30] sm:$0xff]  ;;  %v878_v51 = vld [vmem:[#allocation10 + $0x28] sm:$0xff]  ;;  %v885_v52 = vld [vmem:[#allocation10 + $0x60] sm:$0xff] }
  0x31   :  { %396 = vmatpush.bf16.msrb.mxu0 %v676_v10  ;;  %371 = vmatpush.bf16.msra.mxu2 %v664_v16  ;;  %v877_v53 = vld [vmem:[#allocation10 + $0x20] sm:$0xff]  ;;  %v884_v54 = vld [vmem:[#allocation10 + $0x58] sm:$0xff]  ;;  %v883_v56 = vld [vmem:[#allocation10 + $0x50] sm:$0xff] }
  0x32   :  { %409 = vmatpush.bf16.msrb.mxu1 %v740_v13  ;;  %384 = vmatpush.bf16.msra.mxu3 %v728_v19  ;;  %v108_v55 = vld [vmem:[#allocation7] sm:$0x3]  ;;  %v882_v6 = vld [vmem:[#allocation10 + $0x48] sm:$0xff]  ;;  %v875_v7 = vld [vmem:[#allocation10 + $0x10] sm:$0xff] }
  0x33   :  { %v110_v57 = vperm.slane %v108_v55, 0  ;;  %v111_v58 = vperm.slane %v108_v55, 1  ;;  %v876_v5 = vld [vmem:[#allocation10 + $0x18] sm:$0xff]  ;;  %v881_v8 = vld [vmem:[#allocation10 + $0x40] sm:$0xff]  ;;  %v874_v9 = vld [vmem:[#allocation10 + $0x8] sm:$0xff] }
  0x34   :  { %v873_v10 = vld [vmem:[#allocation10] sm:$0xff]  ;;  %v200_v11 = vld [vmem:[%s1136_s4] sm:$0x3] }
  0x35   :  { %397 = vmatpush.bf16.msrb.mxu0 %v668_v20  ;;  %372 = vmatpush.bf16.msra.mxu2 %v656_v25  ;;  %v203_v12 = vperm.slane %v200_v11, 1  ;;  %v202_v17 = vperm.slane %v200_v11, 0  ;;  %v899_v32 = vld [vmem:[%s1138_s6] ss:$0 sm:$0xff]  ;;  %s1065_s6 = smov [#allocation11]  }
  0x36   :  { %410 = vmatpush.bf16.msrb.mxu1 %v732_v21  ;;  %385 = vmatpush.bf16.msra.mxu3 %v720_v29  ;;  %s613_s28 = sshll.u32 %s1065_s6, 4  ;;  %s614_s28 = int_to_ptr.vmem [resolvable:$true] %s613_s28 }
  0x39   :  { %398 = vmatpush.bf16.msrb.mxu0 %v660_v30  ;;  %373 = vmatpush.bf16.msra.mxu2 %v648_v37 }
  0x3a   :  { %411 = vmatpush.bf16.msrb.mxu1 %v724_v33  ;;  %386 = vmatpush.bf16.msra.mxu3 %v712_v41  ;;  %v581_v33 = vand.u32 127, %v580_v31 }
  0x3c   :  { %vm582_vm1 = vcmp.lt.s32.totalorder %v581_v33, 8 }
  0x3d   :  { %399 = vmatpush.bf16.msrb.mxu0 %v652_v42  ;;  %554 = vmatpush.bf16.msrb.mxu2 %v880_v47 }
  0x3e   :  { %412 = vmatpush.bf16.msrb.mxu1 %v716_v45  ;;  %567 = vmatpush.bf16.msrb.mxu3 %v888_v46 }
  0x41   :  { %555 = vmatpush.bf16.msrb.mxu2 %v879_v49 }
  0x42   :  { %568 = vmatpush.bf16.msrb.mxu3 %v887_v48 }
  0x45   :  { %556 = vmatpush.bf16.msrb.mxu2 %v878_v51 }
  0x46   :  { %569 = vmatpush.bf16.msrb.mxu3 %v886_v50 }
  0x49   :  { %557 = vmatpush.bf16.msrb.mxu2 %v877_v53 }
  0x4a   :  { %570 = vmatpush.bf16.msrb.mxu3 %v885_v52 }
  0x4d   :  { %558 = vmatpush.bf16.msrb.mxu2 %v876_v5 }
  0x4e   :  { %571 = vmatpush.bf16.msrb.mxu3 %v884_v54 }
  0x51   :  { %559 = vmatpush.bf16.msrb.mxu2 %v875_v7 }
  0x52   :  { %572 = vmatpush.bf16.msrb.mxu3 %v883_v56 }
  0x55   :  { %560 = vmatpush.bf16.msrb.mxu2 %v874_v9 }
  0x56   :  { %573 = vmatpush.bf16.msrb.mxu3 %v882_v6 }
  0x59   :  { %561 = vmatpush.bf16.msrb.mxu2 %v873_v10 }
  0x5a   :  { %574 = vmatpush.bf16.msrb.mxu3 %v881_v8 }
  0x9d   :  { %v147_v59 = vpop.f32.mrf.mxu0 }
  0x9e   :  { %v148_v60 = vadd.f32 %v147_v59, %v110_v57 }
  0xa0   :  { %v160_v61 = vpop.f32.mrf.mxu1  ;;  %v164_v63 = vmax.f32 %v148_v60, 0.0 }
  0xa1   :  { %v161_v62 = vadd.f32 %v160_v61, %v111_v58 }
  0xa2   :  { %v166_v1 = vpack.c.bf16 %v164_v63, %v164_v63 }
  0xa3   :  { %v165_v0 = vmax.f32 %v161_v62, 0.0 }
  0xa4   :  { %374 = vmatmul.bf16.vlgmr.msra.gmra.mxu2 %v166_v1  ;;  %400 = vmatmul.bf16.vlgmr.msrb.gmra.mxu0 %v166_v1 }
  0xa5   :  { %v167_v2 = vpack.c.bf16 %v165_v0, %v165_v0  ;;  %v149_v3 = vpop.f32.mrf.mxu0 }
  0xa7   :  { %387 = vmatmul.bf16.vlgmr.msra.gmra.mxu3 %v167_v2  ;;  %413 = vmatmul.bf16.vlgmr.msrb.gmra.mxu1 %v167_v2 }
  0xa8   :  { %v162_v4 = vpop.f32.mrf.mxu1 }
 0x121   :  { %v401_v13 = vpop.f32.mrf.mxu0 }
 0x122   :  { %v402_v14 = vadd.f32 %v401_v13, %v203_v12 }
 0x124   :  { %v414_v15 = vpop.f32.mrf.mxu1 }
 0x125   :  { %v415_v16 = vadd.f32 %v414_v15, %v402_v14 }
 0x127   :  { %v419_v18 = vmax.f32 %v415_v16, 0.0  ;;  %v375_v19 = vpop.f32.mrf.mxu2 }
 0x128   :  { %v376_v21 = vadd.f32 %v375_v19, %v202_v17 }
 0x129   :  { %v421_v20 = vpack.c.bf16 %v419_v18, %v419_v18  ;;  %v403_v23 = vpop.f32.mrf.mxu0 }
 0x12a   :  { %v388_v22 = vpop.f32.mrf.mxu3 }
 0x12b   :  { %v389_v24 = vadd.f32 %v388_v22, %v376_v21  ;;  %575 = vmatmul.bf16.vlgmr.msrb.gmra.mxu3 %v421_v20 }
 0x12c   :  { %v416_v25 = vpop.f32.mrf.mxu1 }
 0x12d   :  { %v418_v26 = vmax.f32 %v389_v24, 0.0 }
 0x12f   :  { %v420_v27 = vpack.c.bf16 %v418_v26, %v418_v26  ;;  %v377_v28 = vpop.f32.mrf.mxu2 }
 0x131   :  { %562 = vmatmul.bf16.vlgmr.msrb.gmra.mxu2 %v420_v27 }
 0x132   :  { %v390_v29 = vpop.f32.mrf.mxu3 }
 0x1ae   :  { %v576_v30 = vpop.f32.mrf.mxu3 }
 0x1b4   :  { %v563_v34 = vpop.f32.mrf.mxu2 }
 0x1b5   :  { %v564_v35 = vadd.f32 %v899_v32, %v563_v34 }
 0x1b6   :  { %v578_v36 = vpop.f32.mrf.mxu3 }
 0x1b7   :  { %v577_v37 = vadd.f32 %v576_v30, %v564_v35 }
 0x1b9   :  { %v583_v38 = vsel %vm582_vm1, %v577_v37, -1e+30 }
 0x1ba   :  { %584 = vmax.xlane.f32.xlu0 %v583_v38 }
 0x1bc   :  { %v565_v39 = vpop.f32.mrf.mxu2 }
 0x22d   :  { %v585_v40 = vpop.xlane.xlu0 %584 }
 0x22e   :  { %v586_v41 = vsub.f32 %v583_v38, %v585_v40 }
 0x230   :  { %v587_v42 = vmul.f32 1.442695, %v586_v41 }
 0x232   :  { %900 = vpow2.f32 %v587_v42 }
 0x238   :  { %v901_v43 = vpop.eup %900 }
 0x239   :  { %589 = vadd.xlane.f32.xlu0 %v901_v43 }
 0x2ac   :  { %v590_v44 = vpop.xlane.xlu0 %589 }
 0x2ad   :  { %902 = vrcp.f32 %v590_v44  ;;  %v602_v48 = vand.u32 2147483648, %v590_v44  ;;  %v600_v50 = vand.u32 2147483647, %v590_v44  ;;  %vm596_vm3 = vweird.f32 %v590_v44 }
 0x2af   :  { %v603_v52 = vor.u32 1.1754944e-38, %v602_v48  ;;  %vm601_vm5 = vcmp.eq.f32.partialorder %v600_v50, 8.507059e+37 }
 0x2b3   :  { %v903_v45 = vpop.eup %902 }
 0x2b4   :  { %v592_v46 = vmul.f32 %v903_v45, %v590_v44  ;;  %vm597_vm2 = vweird.f32 %v903_v45 }
 0x2b5   :  { %vm598_vm4 = vmor %vm596_vm3, %vm597_vm2 }
 0x2b6   :  { %v593_v47 = vsub.f32 1.0, %v592_v46 }
 0x2b8   :  { %v594_v49 = vmul.f32 %v903_v45, %v593_v47 }
 0x2ba   :  { %v595_v51 = vadd.f32 %v903_v45, %v594_v49 }
 0x2bc   :  { %v599_v53 = vsel %vm598_vm4, %v903_v45, %v595_v51 }
 0x2bd   :  { %v604_v54 = vsel %vm601_vm5, %v603_v52, %v599_v53 }
 0x2be   :  { %v605_v55 = vmul.f32 %v901_v43, %v604_v54 }
 0x2c0   :  { %v606_v56 = vpack.c.bf16 %v605_v55, %v605_v55 }
 0x2c2   :  { %607 = vst [vmem:[#allocation11] sm:$0xf] %v606_v56 }
 0x2c3   :  { %618 = dma.vmem_to_hbm [thread:$0]  %s614_s28, 64, %s616_s8, [#allocation4]  }
 0x2c4   :  { %1054 = dma.done.wait [#allocation4], 64  }
 0x2c5   :  { %1055 = vsyncadd [#allocation4], 4294967232 }
 0x2c6   :  { %623 = vsyncpa [#allocation3], 1 }
 0x2c7   :  { %624 = vsyncpa [#allocation6], 1 }
 0x2c8   :  { %625 = vsyncpa [#allocation9], 1 }
 0x2c9   :  { %626 = vsyncpa [#allocation4], 1 }

</bundles_post_ra>
